<compile_context>
chip_gen: v5e
topology: v5e:2x2
jax: 0.10.0
libtpu: 0.0.40
codegen_flags: <defaults>
</compile_context>

<pallas_src>
import functools

import jax
import jax.numpy as jnp
from jax.experimental import pallas as pl
from jax.experimental.pallas import tpu as pltpu


# ----------------------------------------------------------------------------
# One-time parameter preparation (hoisted out of the per-call forward path).
# ----------------------------------------------------------------------------
def prepare_proj_params(weight, bias, channels, num_input, num_output):
    """Rearrange Conv2d params so the kernel's matmul output is already in
    (r, q) = (channel, extrapolation-step) column order.

      weight: (c*num_output, c, 1, num_input), out-channel index oc = q*c + r
      bias  : (c*num_output,)

    Returns:
      w_proj: (c, num_input, c*num_output) with w_proj[ic, k, r*num_output + q]
              == weight[q*c + r, ic, 0, k]
      b_proj: (1, c*num_output) with b_proj[0, r*num_output + q] == bias[q*c + r]
    """
    c, p = channels, num_output
    w = weight.reshape(c * p, c, num_input)        # (q*c+r, ic, k)
    w = w.reshape(p, c, c, num_input)              # (q, r, ic, k)
    w = jnp.transpose(w, (2, 3, 1, 0))             # (ic, k, r, q)
    w_proj = w.reshape(c, num_input, c * p)        # (ic, k, r*p + q)
    b_proj = bias.reshape(p, c).T.reshape(1, c * p)
    return w_proj, b_proj


# ----------------------------------------------------------------------------
# Fused kernel: copy-through of x + projection into the trailing columns.
# ----------------------------------------------------------------------------
def _fused_kernel(x_ref, w_ref, b_ref, o_ref, *, t, num_input, num_output, channels):
    # x_ref: (1, c, TN, t)            w_ref: (c, num_input, c*num_output)
    # b_ref: (1, c*num_output)        o_ref: (1, c, TN, t + num_output)
    x_blk = x_ref[0]                                     # (c, TN, t)

    # Fused concat: pass the original time steps straight through.
    o_ref[0, :, :, 0:t] = x_blk

    tn = x_blk.shape[1]
    ncols = channels * num_output

    # Projection: accumulate over input channels (small static loop).
    acc = jnp.zeros((tn, ncols), jnp.float32)
    for ic in range(channels):
        x_ic = x_blk[ic, :, t - num_input:]              # (TN, num_input)
        acc = acc + jnp.dot(x_ic, w_ref[ic],
                            preferred_element_type=jnp.float32)
    acc = (acc + b_ref[...]).astype(o_ref.dtype)         # (TN, c*num_output)

    # Columns are already ordered (r, q): write each output channel's
    # num_output extrapolated steps into the trailing lanes of its row slab.
    for r in range(channels):
        o_ref[0, r, :, t:] = acc[:, r * num_output:(r + 1) * num_output]


def _pick_tile_n(n, c, t, p, dtype_bytes=4, vmem_budget_bytes=8 * 1024 * 1024):
    """Largest node tile (multiple of 8) whose double-buffered x + out blocks
    fit a conservative VMEM budget (safe for v5e's 16 MiB scoped default and
    v7x's 64 MiB physical VMEM)."""
    per_row = c * (t + (t + p)) * dtype_bytes * 2        # x blk + out blk, 2 buffers
    tn = vmem_budget_bytes // max(per_row, 1)
    tn = min(tn, 1024, n)
    if tn >= n:
        return n
    return max(8, (tn // 8) * 8)


# ----------------------------------------------------------------------------
# Forward pass.
# ----------------------------------------------------------------------------
def residual_extrapolate(x, w_proj, b_proj, num_input, num_output, *, tile_n=None):
    """x: (b, c, n, t); w_proj/b_proj from prepare_proj_params.
    Returns (b, c, n, t + num_output)."""
    b, c, n, t = x.shape
    p = num_output
    ncols = c * p
    tn = tile_n if tile_n is not None else _pick_tile_n(n, c, t, p)
    n_tiles = pl.cdiv(n, tn)

    kernel = functools.partial(
        _fused_kernel, t=t, num_input=num_input, num_output=p, channels=c)

    return pl.pallas_call(
        kernel,
        out_shape=jax.ShapeDtypeStruct((b, c, n, t + p), x.dtype),
        grid_spec=pltpu.PrefetchScalarGridSpec(
            num_scalar_prefetch=0,
            grid=(b, n_tiles),
            in_specs=[
                pl.BlockSpec((1, c, tn, t), lambda bi, ni: (bi, 0, ni, 0)),
                pl.BlockSpec((c, num_input, ncols), lambda bi, ni: (0, 0, 0)),
                pl.BlockSpec((1, ncols), lambda bi, ni: (0, 0)),
            ],
            out_specs=pl.BlockSpec((1, c, tn, t + p),
                                   lambda bi, ni: (bi, 0, ni, 0)),
        ),
        compiler_params=pltpu.CompilerParams(
            dimension_semantics=("parallel", "parallel")),
    )(x, w_proj, b_proj)


# ----------------------------------------------------------------------------
# Pure-JAX reference (PyTorch semantics) for verification.
# ----------------------------------------------------------------------------
def _reference(x, weight, bias, num_input, num_output):
    b, c, n, t = x.shape
    x_last = x[:, :, :, -num_input:]                                   # (b, c, n, k)
    conv = jnp.einsum('bcnk,ock->bon', x_last, weight[:, :, 0, :]) \
        + bias[None, :, None]
    proj = conv.reshape(b, num_output, c, n)                           # reshape(b,-1,c,n)
    proj = jnp.transpose(proj, (0, 2, 3, 1))                           # permute(0,2,3,1)
    return jnp.concatenate([x, proj], axis=-1)


if __name__ == "__main__":
    # Small shapes consistent with the module's forward.
    b, c, n, t = 2, 4, 16, 16
    num_input, num_output = 8, 4

    key = jax.random.PRNGKey(0)
    kx, kw, kb = jax.random.split(key, 3)

    x = jax.random.normal(kx, (b, c, n, t), dtype=jnp.float32)
    # Synthetic params matching nn.Conv2d(c, c*num_output, (1, num_input)).
    fan_in = c * num_input
    weight = jax.random.normal(
        kw, (c * num_output, c, 1, num_input), dtype=jnp.float32) * (fan_in ** -0.5)
    bias = jax.random.normal(kb, (c * num_output,), dtype=jnp.float32) * 0.1

    # One-time parameter rearrangement (would live in module init / setup).
    w_proj, b_proj = prepare_proj_params(weight, bias, c, num_input, num_output)

    out = residual_extrapolate(x, w_proj, b_proj, num_input, num_output)
    out = jax.block_until_ready(out)

    ref = _reference(x, weight, bias, num_input, num_output)
    assert out.shape == (b, c, n, t + num_output), out.shape
    assert jnp.allclose(out, ref, rtol=1e-5, atol=1e-5), "mismatch vs reference"

    print("KERNEL_OK")
</pallas_src>

<mosaic_0001>
module attributes {stable_mosaic.version = 11 : i64} {
  func.func @_fused_kernel(%arg0: i32, %arg1: i32, %arg2: memref<1x4x16x16xf32, #tpu.memory_space<vmem>>, %arg3: memref<4x8x16xf32, #tpu.memory_space<vmem>>, %arg4: memref<1x16xf32, #tpu.memory_space<vmem>>, %arg5: memref<1x4x16x20xf32, #tpu.memory_space<vmem>>) attributes {dimension_semantics = [#tpu.dimension_semantics<parallel>, #tpu.dimension_semantics<parallel>], iteration_bounds = array<i64: 2, 1>, scalar_prefetch = 0 : i64, scratch_operands = 0 : i64, tpu.core_type = #tpu.core_type<tc>, window_params = [{transform_indices = @transform_0, window_bounds = array<i64: 1, 4, 16, 16>}, {pipeline_mode = #tpu.pipeline_mode<synchronous>, transform_indices = @transform_1, window_bounds = array<i64: 4, 8, 16>}, {pipeline_mode = #tpu.pipeline_mode<synchronous>, transform_indices = @transform_2, window_bounds = array<i64: 1, 16>}, {transform_indices = @transform_3, window_bounds = array<i64: 1, 4, 16, 20>}]} {
    %c0 = arith.constant 0 : index
    %c0_0 = arith.constant 0 : index
    %c0_1 = arith.constant 0 : index
    %c0_2 = arith.constant 0 : index
    %0 = vector.load %arg2[%c0, %c0_0, %c0_1, %c0_2] : memref<1x4x16x16xf32, #tpu.memory_space<vmem>>, vector<1x4x16x16xf32>
    %1 = vector.shape_cast %0 : vector<1x4x16x16xf32> to vector<4x16x16xf32>
    %c0_3 = arith.constant 0 : index
    %c0_4 = arith.constant 0 : index
    %c0_5 = arith.constant 0 : index
    %c0_6 = arith.constant 0 : index
    %2 = vector.load %arg5[%c0_3, %c0_4, %c0_5, %c0_6] : memref<1x4x16x20xf32, #tpu.memory_space<vmem>>, vector<1x4x16x16xf32>
    %3 = vector.shape_cast %2 : vector<1x4x16x16xf32> to vector<4x16x16xf32>
    %4 = vector.shape_cast %1 : vector<4x16x16xf32> to vector<1x4x16x16xf32>
    tpu.vector_store %arg5[%c0_3, %c0_4, %c0_5, %c0_6], %4 {strides = array<i32>} : memref<1x4x16x20xf32, #tpu.memory_space<vmem>>, vector<1x4x16x16xf32>,
    %cst = arith.constant 0.000000e+00 : f32
    %5 = vector.broadcast %cst : f32 to vector<16x16xf32>
    %6 = vector.extract_strided_slice %1 {offsets = [0, 0, 8], sizes = [1, 16, 8], strides = [1, 1, 1]} : vector<4x16x16xf32> to vector<1x16x8xf32>
    %7 = vector.shape_cast %6 : vector<1x16x8xf32> to vector<16x8xf32>
    %c0_7 = arith.constant 0 : index
    %c0_8 = arith.constant 0 : index
    %c0_9 = arith.constant 0 : index
    %8 = vector.load %arg3[%c0_7, %c0_8, %c0_9] : memref<4x8x16xf32, #tpu.memory_space<vmem>>, vector<1x8x16xf32>
    %9 = vector.shape_cast %8 : vector<1x8x16xf32> to vector<8x16xf32>
    %cst_10 = arith.constant dense<0.000000e+00> : vector<16x16xf32>
    %10 = tpu.matmul %7, %9, %cst_10 {dimension_numbers = #tpu.dot_dimension_numbers<[1], [0], [0], [1], [0, 0, 1, 1], [], []>} : vector<16x8xf32>, vector<8x16xf32>, vector<16x16xf32> -> vector<16x16xf32>
    %11 = arith.addf %5, %10 : vector<16x16xf32>
    %12 = vector.extract_strided_slice %1 {offsets = [1, 0, 8], sizes = [1, 16, 8], strides = [1, 1, 1]} : vector<4x16x16xf32> to vector<1x16x8xf32>
    %13 = vector.shape_cast %12 : vector<1x16x8xf32> to vector<16x8xf32>
    %c1 = arith.constant 1 : index
    %c0_11 = arith.constant 0 : index
    %c0_12 = arith.constant 0 : index
    %14 = vector.load %arg3[%c1, %c0_11, %c0_12] : memref<4x8x16xf32, #tpu.memory_space<vmem>>, vector<1x8x16xf32>
    %15 = vector.shape_cast %14 : vector<1x8x16xf32> to vector<8x16xf32>
    %cst_13 = arith.constant dense<0.000000e+00> : vector<16x16xf32>
    %16 = tpu.matmul %13, %15, %cst_13 {dimension_numbers = #tpu.dot_dimension_numbers<[1], [0], [0], [1], [0, 0, 1, 1], [], []>} : vector<16x8xf32>, vector<8x16xf32>, vector<16x16xf32> -> vector<16x16xf32>
    %17 = arith.addf %11, %16 : vector<16x16xf32>
    %18 = vector.extract_strided_slice %1 {offsets = [2, 0, 8], sizes = [1, 16, 8], strides = [1, 1, 1]} : vector<4x16x16xf32> to vector<1x16x8xf32>
    %19 = vector.shape_cast %18 : vector<1x16x8xf32> to vector<16x8xf32>
    %c2 = arith.constant 2 : index
    %c0_14 = arith.constant 0 : index
    %c0_15 = arith.constant 0 : index
    %20 = vector.load %arg3[%c2, %c0_14, %c0_15] : memref<4x8x16xf32, #tpu.memory_space<vmem>>, vector<1x8x16xf32>
    %21 = vector.shape_cast %20 : vector<1x8x16xf32> to vector<8x16xf32>
    %cst_16 = arith.constant dense<0.000000e+00> : vector<16x16xf32>
    %22 = tpu.matmul %19, %21, %cst_16 {dimension_numbers = #tpu.dot_dimension_numbers<[1], [0], [0], [1], [0, 0, 1, 1], [], []>} : vector<16x8xf32>, vector<8x16xf32>, vector<16x16xf32> -> vector<16x16xf32>
    %23 = arith.addf %17, %22 : vector<16x16xf32>
    %24 = vector.extract_strided_slice %1 {offsets = [3, 0, 8], sizes = [1, 16, 8], strides = [1, 1, 1]} : vector<4x16x16xf32> to vector<1x16x8xf32>
    %25 = vector.shape_cast %24 : vector<1x16x8xf32> to vector<16x8xf32>
    %c3 = arith.constant 3 : index
    %c0_17 = arith.constant 0 : index
    %c0_18 = arith.constant 0 : index
    %26 = vector.load %arg3[%c3, %c0_17, %c0_18] : memref<4x8x16xf32, #tpu.memory_space<vmem>>, vector<1x8x16xf32>
    %27 = vector.shape_cast %26 : vector<1x8x16xf32> to vector<8x16xf32>
    %cst_19 = arith.constant dense<0.000000e+00> : vector<16x16xf32>
    %28 = tpu.matmul %25, %27, %cst_19 {dimension_numbers = #tpu.dot_dimension_numbers<[1], [0], [0], [1], [0, 0, 1, 1], [], []>} : vector<16x8xf32>, vector<8x16xf32>, vector<16x16xf32> -> vector<16x16xf32>
    %29 = arith.addf %23, %28 : vector<16x16xf32>
    %c0_20 = arith.constant 0 : index
    %c0_21 = arith.constant 0 : index
    %30 = vector.load %arg4[%c0_20, %c0_21] : memref<1x16xf32, #tpu.memory_space<vmem>>, vector<1x16xf32>
    %31 = vector.broadcast %30 : vector<1x16xf32> to vector<16x16xf32>
    %32 = arith.addf %29, %31 : vector<16x16xf32>
    %33 = vector.extract_strided_slice %32 {offsets = [0, 0], sizes = [16, 4], strides = [1, 1]} : vector<16x16xf32> to vector<16x4xf32>
    %c0_22 = arith.constant 0 : index
    %c0_23 = arith.constant 0 : index
    %c0_24 = arith.constant 0 : index
    %c16 = arith.constant 16 : index
    %34 = vector.load %arg5[%c0_22, %c0_23, %c0_24, %c16] : memref<1x4x16x20xf32, #tpu.memory_space<vmem>>, vector<1x1x16x4xf32>
    %35 = vector.shape_cast %34 : vector<1x1x16x4xf32> to vector<16x4xf32>
    %36 = vector.shape_cast %33 : vector<16x4xf32> to vector<1x1x16x4xf32>
    tpu.vector_store %arg5[%c0_22, %c0_23, %c0_24, %c16], %36 {strides = array<i32>} : memref<1x4x16x20xf32, #tpu.memory_space<vmem>>, vector<1x1x16x4xf32>,
    %37 = vector.extract_strided_slice %32 {offsets = [0, 4], sizes = [16, 4], strides = [1, 1]} : vector<16x16xf32> to vector<16x4xf32>
    %c0_25 = arith.constant 0 : index
    %c1_26 = arith.constant 1 : index
    %c0_27 = arith.constant 0 : index
    %c16_28 = arith.constant 16 : index
    %38 = vector.load %arg5[%c0_25, %c1_26, %c0_27, %c16_28] : memref<1x4x16x20xf32, #tpu.memory_space<vmem>>, vector<1x1x16x4xf32>
    %39 = vector.shape_cast %38 : vector<1x1x16x4xf32> to vector<16x4xf32>
    %40 = vector.shape_cast %37 : vector<16x4xf32> to vector<1x1x16x4xf32>
    tpu.vector_store %arg5[%c0_25, %c1_26, %c0_27, %c16_28], %40 {strides = array<i32>} : memref<1x4x16x20xf32, #tpu.memory_space<vmem>>, vector<1x1x16x4xf32>,
    %41 = vector.extract_strided_slice %32 {offsets = [0, 8], sizes = [16, 4], strides = [1, 1]} : vector<16x16xf32> to vector<16x4xf32>
    %c0_29 = arith.constant 0 : index
    %c2_30 = arith.constant 2 : index
    %c0_31 = arith.constant 0 : index
    %c16_32 = arith.constant 16 : index
    %42 = vector.load %arg5[%c0_29, %c2_30, %c0_31, %c16_32] : memref<1x4x16x20xf32, #tpu.memory_space<vmem>>, vector<1x1x16x4xf32>
    %43 = vector.shape_cast %42 : vector<1x1x16x4xf32> to vector<16x4xf32>
    %44 = vector.shape_cast %41 : vector<16x4xf32> to vector<1x1x16x4xf32>
    tpu.vector_store %arg5[%c0_29, %c2_30, %c0_31, %c16_32], %44 {strides = array<i32>} : memref<1x4x16x20xf32, #tpu.memory_space<vmem>>, vector<1x1x16x4xf32>,
    %45 = vector.extract_strided_slice %32 {offsets = [0, 12], sizes = [16, 4], strides = [1, 1]} : vector<16x16xf32> to vector<16x4xf32>
    %c0_33 = arith.constant 0 : index
    %c3_34 = arith.constant 3 : index
    %c0_35 = arith.constant 0 : index
    %c16_36 = arith.constant 16 : index
    %46 = vector.load %arg5[%c0_33, %c3_34, %c0_35, %c16_36] : memref<1x4x16x20xf32, #tpu.memory_space<vmem>>, vector<1x1x16x4xf32>
    %47 = vector.shape_cast %46 : vector<1x1x16x4xf32> to vector<16x4xf32>
    %48 = vector.shape_cast %45 : vector<16x4xf32> to vector<1x1x16x4xf32>
    tpu.vector_store %arg5[%c0_33, %c3_34, %c0_35, %c16_36], %48 {strides = array<i32>} : memref<1x4x16x20xf32, #tpu.memory_space<vmem>>, vector<1x1x16x4xf32>,
    return
  }
  func.func @transform_0(%arg0: i32, %arg1: i32) -> (i32, i32, i32, i32) {
    %c0_i32 = arith.constant 0 : i32
    %c0_i32_0 = arith.constant 0 : i32
    %c0_i32_1 = arith.constant 0 : i32
    return %arg0, %c0_i32, %arg1, %c0_i32_0 : i32, i32, i32, i32
  }
  func.func @transform_1(%arg0: i32, %arg1: i32) -> (i32, i32, i32) {
    %c0_i32 = arith.constant 0 : i32
    %c0_i32_0 = arith.constant 0 : i32
    %c0_i32_1 = arith.constant 0 : i32
    %c0_i32_2 = arith.constant 0 : i32
    return %c0_i32, %c0_i32_0, %c0_i32_1 : i32, i32, i32
  }
  func.func @transform_2(%arg0: i32, %arg1: i32) -> (i32, i32) {
    %c0_i32 = arith.constant 0 : i32
    %c0_i32_0 = arith.constant 0 : i32
    %c0_i32_1 = arith.constant 0 : i32
    return %c0_i32, %c0_i32_0 : i32, i32
  }
  func.func @transform_3(%arg0: i32, %arg1: i32) -> (i32, i32, i32, i32) {
    %c0_i32 = arith.constant 0 : i32
    %c0_i32_0 = arith.constant 0 : i32
    %c0_i32_1 = arith.constant 0 : i32
    return %arg0, %c0_i32, %arg1, %c0_i32_0 : i32, i32, i32, i32
  }
}

</mosaic_0001>

<bundles_post_ra>
// kernel: tpu_custom_call.1
= control target key start
LH: loop header
LB: loop body
LE: loop exit
PB: predicated region body
PF: predicated region fallthrough
CT: control target
= control target key end

     0   :  { %s1044_s0 = inlined_call_operand.hbm [shape: f32[2,4,16,16], index: 0, kind: input, shape index: {}]   ;;  %s1045_s1 = inlined_call_operand.hbm [shape: f32[4,8,16], index: 1, kind: input, shape index: {}]   ;;  %s1046_s2 = inlined_call_operand.vmem [shape: f32[1,16], index: 2, kind: input, shape index: {}]   ;;  %s1047_s3 = inlined_call_operand.hbm [shape: f32[2,4,16,20], index: 3, kind: output, shape index: {}]  }
   0x1   :  { %1049 = sst [smem:[#allocation11_spill]] %s1045_s1 }
   0x2   :  { %8 = vsyncpa [#allocation3], 0 }
   0x3   :  { %10 = vsyncpa [#allocation3 + $0x1], 0 }
   0x4   :  { %11 = vsyncpa [#allocation6], 0 }
   0x5   :  { %12 = vsyncpa [#allocation4], 0 }
   0x6   :  { %14 = vsyncpa [#allocation4 + $0x1], 0  ;;  %s840_s12 = smov 0   ;;  %s842_s13 = smov 0  }
   0x7   :  { %s844_s14 = smov 0   ;;  %s846_s15 = smov 0  }
   0x8   :  { %s848_s16 = smov 0   ;;  %s850_s17 = smov 0  }
   0x9 LB: > { %s548_s18 = sadd.s32 4294967295, %s809_s17   ;;  %s549_s19 = sadd.s32 4294967294, %s809_s17   ;;  %s809_s17 = sphi %s850_s17, %s20_s17   ;;  %s805_s16 = sphi %s848_s16, %s1063_s16   ;;  %s801_s15 = sphi %s846_s15, %s1062_s15   ;;  %s797_s14 = sphi %s844_s14, %s1061_s14   ;;  %s793_s13 = sphi %s842_s13, %s1060_s13   ;;  %s789_s12 = sphi %s840_s12, %s1059_s12  }
   0xa   : > { %p54_p0 = scmp.ne.s32.totalorder %s793_s13, %s789_s12  ;;  %p874_p1 = scmp.eq.s32.totalorder %s548_s18, 0 }
   0xb   : > { %p878_p2 = scmp.eq.s32.totalorder %s548_s18, 1  ;;  %p128_p3 = scmp.eq.s32.totalorder %s549_s19, 1 }
   0xc   : > { %p884_p4 = por %p874_p1, %p54_p0  ;;  %p550_p5 = scmp.ge.s32.totalorder %s809_s17, 1 }
   0xd   : > { %p889_p6 = por %p128_p3, %p54_p0  ;;  %p135_p7 = scmp.lt.s32.totalorder %s809_s17, 3 }
   0xe   : > { %s1054_s1 = sld [smem:[#allocation11_spill]]  ;;  %s811_s28 = smov [#allocation5]  }
   0xf   : > { %p897_p8 = pnand %p550_p5, %p135_p7  ;;  %s148_s29 = sshll.u32 %s811_s28, 4  ;;  %s149_s29 = int_to_ptr.vmem [resolvable:$true] %s148_s29 }
  0x10   : > { %p552_p11 = scmp.ge.s32.totalorder %s809_s17, 2  ;;  %s1048_s30 = smov 128  }
  0x11   : > { %p589_p9 = pneg %p897_p8  ;;  %s813_s4 = smov 8  }
  0x12   : > { %s32_s5 = sadd.s32 1, %s805_s16  ;;  %s41_s6 = sadd.s32 1, %s797_s14 }
  0x13   : > { %p590_p10 = pnand %p589_p9, %p874_p1  ;;  %p34_p12 = scmp.ge.s32.totalorder %s32_s5, 2 }
  0x14   : > { %s146_s26 = sshll.u32 %s1054_s1, 4  ;;  %p48_p13 = scmp.ne.s32.totalorder %s797_s14, %s793_s13  ;;  %s147_s26 = int_to_ptr.hbm [resolvable:$true] %s146_s26 }
  0x15   : > { %592 = dma.hbm_to_vmem [thread:$0]  (!%p590_p10), %s147_s26, 512, %s149_s29, [#allocation6], %s1048_s30, %s1048_s30, %s813_s4  }
  0x16   : > { %p49_p0 = scmp.eq.s32.totalorder %s809_s17, 0  ;;  %s1065_s5 = smov (%p34_p12, %s32_s5), 0 }
  0x17   : > { %p922_p5 = por %p878_p2, %p48_p13  ;;  %s36_s9 = ssub.s32 %s805_s16, %s1065_s5 }
  0x18   : > { %p916_p3 = por %p49_p0, %p48_p13  ;;  %p602_p7 = scmp.lt.s32.totalorder %s809_s17, 2 }
  0x19   : > { %p39_p9 = scmp.eq.s32.totalorder %s36_s9, 0  ;;  %s165_s10 = sand.u32 1, %s797_s14  }
  0x1a   : > { %s553_s11 = sshll.u32 %s165_s10, 6  ;;  %s579_s19 = sshll.u32 %s805_s16, 6 }
  0x1b   : > { %s931_s18 = scalar_select %p39_p9, %s797_s14, %s41_s6  }
  0x1c   : > { %s176_s26 = scalar_lea.hbm %s1044_s0, %s579_s19  ;;  %s169_s28 = scalar_lea.vmem [#allocation2], %s553_s11 }
  0x1d   : > { %s179_s29 = sshll.u32 %s169_s28, 4  ;;  %s177_s21 = sshll.u32 %s176_s26, 4  ;;  %s180_s29 = int_to_ptr.vmem [resolvable:$true] %s179_s29  ;;  %s178_s21 = int_to_ptr.hbm [resolvable:$true] %s177_s21 }
  0x1e   : > { %p594_p2 = pnand %p602_p7, %p916_p3  ;;  %s166_s30 = scalar_lea.sflag [#allocation3], %s165_s10 }
  0x1f   : > { %s1058_s1 = smov 128   ;;  %191 = sbr.rel (%p897_p8) target bundleno = 435 (0x1b3), region = 32 }
  0x20   : > { %596 = dma.hbm_to_vmem [thread:$0]  (!%p594_p2), %s178_s21, 1024, %s180_s29, %s166_s30, %s1058_s1, %s1058_s1, %s813_s4  }
  0x21   : > { %s945_s6 = sand.u32 (!%p897_p8), 1, %s793_s13  }
  0x22   : > { %s557_s9 = sshll.u32 (!%p897_p8), %s945_s6, 6  ;;  %s194_s11 = scalar_lea.sflag (!%p897_p8), [#allocation3], %s945_s6 }
  0x23   : > { %s197_s19 = scalar_lea.vmem (!%p897_p8), [#allocation2], %s557_s9 }
  0x24   : > { %776 = dma.done.wait (%p884_p4), %s194_s11, 1024  }
  0x25   : > { %778 = vsyncadd (%p884_p4), %s194_s11, 4294966272 }
  0x26   : > { %780 = dma.done.wait (%p874_p1), [#allocation6], 512  }
  0x27   : > { %782 = vsyncadd (%p874_p1), [#allocation6], 4294966784  ;;  %v232_v0 = vld [vmem:[%s197_s19 + $0x20] sm:$0xff]  ;;  %vm236_vm0 = vcmask 130048   ;;  %v230_v1 = vld [vmem:[%s197_s19 + $0x10] sm:$0xff]  ;;  %s814_s1 = smov 120  }
  0x28   : > { %319 = vrot.lane.b32.xlu0 %v232_v0, %s814_s1  ;;  %s957_s27 = scalar_lea.vmem [#allocation7], %s557_s9  ;;  %250 = vrot.lane.b32.xlu1 %v230_v1, %s814_s1  ;;  %v316_v2 = vld [vmem:[#allocation5 + $0x10] sm:$0xff]  ;;  %v233_v4 = vld [vmem:[%s197_s19 + $0x28] sm:$0xff]  ;;  %v228_v5 = vld [vmem:[%s197_s19] sm:$0xff]  ;;  %vm254_vm1 = vcmask 64512   ;;  %s815_s30 = smov 8  }
  0x29   : > { %241 = vst.msk [vmem:[%s957_s27 + $0x20] sm:$0xff] %vm236_vm0, %v232_v0  ;;  %v234_v3 = vld [vmem:[%s197_s19 + $0x30] sm:$0xff]  ;;  %342 = vmatpush.msra.mxu2 %v316_v2  ;;  %321 = vrot.lane.b32.xlu2 %v233_v4, %s814_s1  ;;  %v231_v6 = vld [vmem:[%s197_s19 + $0x18] sm:$0xff]  ;;  %v247_v9 = vld [vmem:[#allocation5 + $0x8] sm:$0xff]  ;;  %s816_s4 = smov 12   ;;  %s817_s7 = smov 16  }
  0x2a   : > { %239 = vst.msk [vmem:[%s957_s27 + $0x10] sm:$0xff] %vm236_vm0, %v230_v1  ;;  %v229_v7 = vld [vmem:[%s197_s19 + $0x8] sm:$0xff]  ;;  %v235_v8 = vld [vmem:[%s197_s19 + $0x38] sm:$0xff]  ;;  %v245_v10 = vld [vmem:[#allocation5] sm:$0xff]  ;;  %274 = vmatpush.msra.mxu0 %v247_v9  ;;  %s818_s10 = smov 4   ;;  %vm403_vm2 = vcmask 162944  }
  0x2b   : > { %243 = vst.msk [vmem:[%s957_s27 + $0x30] sm:$0xff] %vm236_vm0, %v234_v3  ;;  %v353_v11 = vld [vmem:[#allocation5 + $0x18] sm:$0xff]  ;;  %307 = vmatpush.msra.mxu1 %v245_v10  ;;  %v662_v25 = vld [vmem:[%s1046_s2] ss:$0 sm:$0xff]  ;;  %s580_s24 = sshll.u32 %s801_s15, 6  ;;  %s448_s29 = sshll.u32 %s957_s27, 4  ;;  %s449_s29 = int_to_ptr.vmem [resolvable:$true] %s448_s29 }
  0x2c   : > { %237 = vst.msk [vmem:[%s957_s27] sm:$0xff] %vm236_vm0, %v228_v5  ;;  %379 = vmatpush.msra.mxu3 %v353_v11  ;;  %s447_s28 = scalar_lea.hbm %s1047_s3, %s580_s24  ;;  %s434_s9 = scalar_lea.sflag [#allocation4], %s945_s6 }
  0x2d   : > { %240 = vst.msk [vmem:[%s957_s27 + $0x18] sm:$0xff] %vm236_vm0, %v231_v6  ;;  %s450_s21 = sshll.u32 %s447_s28, 4  ;;  %s743_s20 = scalar_lea.hbm %s1047_s3, 128  ;;  %s451_s21 = int_to_ptr.hbm [resolvable:$true] %s450_s21 }
  0x2e   : > { %238 = vst.msk [vmem:[%s957_s27 + $0x8] sm:$0xff] %vm236_vm0, %v229_v7  ;;  %s737_s15 = sshra.s32 %s451_s21, 4  ;;  %s738_s15 = int_to_ptr.hbm [resolvable:$true] %s737_s15 }
  0x2f   : > { %242 = vst.msk [vmem:[%s957_s27 + $0x28] sm:$0xff] %vm236_vm0, %v233_v4  ;;  %s739_s11 = scalar_lea.hbm %s738_s15, 64  ;;  %p744_p10 = scmp.lt.s32.totalorder %s738_s15, %s1047_s3 }
  0x30   : > { %244 = vst.msk [vmem:[%s957_s27 + $0x38] sm:$0xff] %vm236_vm0, %v235_v8  ;;  %356 = vrot.lane.b32.xlu0 %v234_v3, %s814_s1  ;;  %284 = vrot.lane.b32.xlu1 %v228_v5, %s814_s1  ;;  %p740_p1 = scmp.ne.s32.totalorder %s738_s15, %s739_s11  ;;  %p745_p12 = scmp.lt.s32.totalorder %s743_s20, %s739_s11 }
  0x31   : > { %358 = vrot.lane.b32.xlu2 %v235_v8, %s814_s1 }
  0x32   : > { %p741_p4 = pnand %p740_p1, %p922_p5  ;;  %p746_p13 = por %p745_p12, %p744_p10 }
  0x34   : > { %p742_p8 = pneg %p741_p4 }
  0x36   : > { %p747_p0 = pnand %p746_p13, %p742_p8 }
  0x38   : > { %252 = vrot.lane.b32.xlu0 %v231_v6, %s814_s1  ;;  %286 = vrot.lane.b32.xlu1 %v229_v7, %s814_s1 }
  0x83   : > { %v322_v14 = vpop.permute.xlu2 %321 }
  0x8b   : > { %v359_v17 = vpop.permute.xlu2 %358 }
  0x9a   : > { %v320_v12 = vpop.permute.xlu0 %319  ;;  %v251_v13 = vpop.permute.xlu1 %250 }
  0x9b   : > { %564 = vmatmul.msk.f32.vlgmr.msra.gmra.mxu2 %vm254_vm1, %v320_v12  ;;  %560 = vmatmul.msk.f32.vlgmr.msra.gmra.mxu0 %vm254_vm1, %v251_v13 }
  0xa2   : > { %v357_v15 = vpop.permute.xlu0 %356  ;;  %v285_v16 = vpop.permute.xlu1 %284 }
  0xa3   : > { %562 = vmatmul.msk.f32.vlgmr.msra.gmra.mxu1 %vm254_vm1, %v285_v16  ;;  %565 = vmatmul.msk.f32.gmra.mxu2 %vm254_vm1, %v322_v14 }
  0xa4   : > { %566 = vmatmul.msk.f32.vlgmr.msra.gmra.mxu3 %vm254_vm1, %v357_v15 }
  0xaa   : > { %v253_v18 = vpop.permute.xlu0 %252  ;;  %v287_v19 = vpop.permute.xlu1 %286 }
  0xab   : > { %561 = vmatmul.msk.f32.gmra.mxu0 %vm254_vm1, %v253_v18  ;;  %563 = vmatmul.msk.f32.gmra.mxu1 %vm254_vm1, %v287_v19 }
  0xac   : > { %567 = vmatmul.msk.f32.gmra.mxu3 %vm254_vm1, %v359_v17 }
 0x118   : > { %v276_v20 = vpop.f32.mrf.mxu0 }
 0x11e   : > { %v344_v23 = vpop.f32.mrf.mxu2 }
 0x120   : > { %v309_v21 = vpop.f32.mrf.mxu1 }
 0x121   : > { %v310_v22 = vadd.f32 %v309_v21, %v276_v20 }
 0x123   : > { %v350_v24 = vadd.f32 %v344_v23, %v310_v22 }
 0x126   : > { %v347_v32 = vpop.f32.mrf.mxu2 }
 0x127   : > { %v381_v26 = vpop.f32.mrf.mxu3 }
 0x128   : > { %v387_v27 = vadd.f32 %v381_v26, %v350_v24  ;;  %v279_v28 = vpop.f32.mrf.mxu0  ;;  %v312_v29 = vpop.f32.mrf.mxu1 }
 0x129   : > { %v313_v31 = vadd.f32 %v312_v29, %v279_v28 }
 0x12a   : > { %v393_v30 = vadd.f32 %v662_v25, %v387_v27 }
 0x12b   : > { %v351_v33 = vadd.f32 %v347_v32, %v313_v31 }
 0x12c   : > { %415 = vrot.lane.b32.xlu0 %v393_v30, %s815_s30  ;;  %406 = vrot.lane.b32.xlu1 %v393_v30, %s816_s4 }
 0x12d   : > { %397 = vrot.lane.b32.xlu2 %v393_v30, %s817_s7 }
 0x12f   : > { %v384_v34 = vpop.f32.mrf.mxu3 }
 0x130   : > { %v388_v35 = vadd.f32 %v384_v34, %v351_v33 }
 0x132   : > { %v394_v36 = vadd.f32 %v662_v25, %v388_v35 }
 0x134   : > { %417 = vrot.lane.b32.xlu1 %v394_v36, %s815_s30  ;;  %399 = vrot.lane.b32.xlu0 %v394_v36, %s817_s7 }
 0x135   : > { %408 = vrot.lane.b32.xlu2 %v394_v36, %s816_s4 }
 0x13c   : > { %426 = vrot.lane.b32.xlu0 %v394_v36, %s818_s10 }
 0x13d   : > { %424 = vrot.lane.b32.xlu2 %v393_v30, %s818_s10 }
 0x187   : > { %v398_v37 = vpop.permute.xlu2 %397 }
 0x188   : > { %404 = vst.msk [vmem:[%s957_s27] sm:$0xff] %vm403_vm2, %v398_v37 }
 0x18f   : > { %v409_v38 = vpop.permute.xlu2 %408 }
 0x190   : > { %569 = vst.msk [vmem:[%s957_s27 + $0x18] sm:$0xff] %vm403_vm2, %v409_v38 }
 0x197   : > { %v425_v39 = vpop.permute.xlu2 %424 }
 0x198   : > { %572 = vst.msk [vmem:[%s957_s27 + $0x30] sm:$0xff] %vm403_vm2, %v425_v39 }
 0x19e   : > { %v416_v40 = vpop.permute.xlu0 %415  ;;  %v407_v41 = vpop.permute.xlu1 %406 }
 0x19f   : > { %570 = vst.msk [vmem:[%s957_s27 + $0x20] sm:$0xff] %vm403_vm2, %v416_v40 }
 0x1a0   : > { %568 = vst.msk [vmem:[%s957_s27 + $0x10] sm:$0xff] %vm403_vm2, %v407_v41 }
 0x1a6   : > { %v400_v42 = vpop.permute.xlu0 %399  ;;  %v418_v43 = vpop.permute.xlu1 %417 }
 0x1a7   : > { %405 = vst.msk [vmem:[%s957_s27 + $0x8] sm:$0xff] %vm403_vm2, %v400_v42 }
 0x1a8   : > { %571 = vst.msk [vmem:[%s957_s27 + $0x28] sm:$0xff] %vm403_vm2, %v418_v43 }
 0x1ae   : > { %v427_v44 = vpop.permute.xlu0 %426 }
 0x1af   : > { %573 = vst.msk [vmem:[%s957_s27 + $0x38] sm:$0xff] %vm403_vm2, %v427_v44 }
 0x1b0   : > { %750 = shalt.err (!%p747_p0)
}
 0x1b1   : > { %s819_s6 = smov 128  }
 0x1b2   : > { %587 = dma.vmem_to_hbm [thread:$0]  (%p922_p5), %s449_s29, 1024, %s451_s21, %s434_s9, %s819_s6, %s819_s6, %s815_s30  }
 0x1b3 PF: > { %s465_s27 = sand.u32 1, %s789_s12   ;;  %p598_p3 = pnand %p552_p11, %p889_p6 }
 0x1b4   : > { %s466_s7 = scalar_lea.sflag [#allocation4], %s465_s27 }
 0x1b5   : > { %p599_p7 = pneg %p598_p3 }
 0x1b7   : > { %784 = dma.done.wait (%p599_p7), %s466_s7, 1024  }
 0x1b8   : > { %786 = vsyncadd (%p599_p7), %s466_s7, 4294966272  ;;  %s20_s17 = sadd.s32 1, %s809_s17   ;;  %s1059_s12 = smov %s793_s13 }
 0x1b9   : > { %p17_p9 = scmp.ge.s32.totalorder %s20_s17, 4   ;;  %s1060_s13 = smov %s797_s14 }
 0x1ba   : > { %s1061_s14 = smov %s931_s18  ;;  %s1062_s15 = smov %s805_s16 }
 0x1bb   : > { %s1063_s16 = smov %s1065_s5  ;;  %19 = sbr.rel (!%p17_p9) target bundleno = 9 (0x9), region = 87 }
 0x1c0   :  { %472 = vsyncpa [#allocation3], 1 }
 0x1c1   :  { %474 = vsyncpa [#allocation3 + $0x1], 1 }
 0x1c2   :  { %475 = vsyncpa [#allocation6], 1 }
 0x1c3   :  { %476 = vsyncpa [#allocation4], 1 }
 0x1c4   :  { %478 = vsyncpa [#allocation4 + $0x1], 1 }

</bundles_post_ra>
